<compile_context>
chip_gen: v5e
topology: v5e:2x2
jax: 0.10.0
libtpu: 0.0.40
codegen_flags: <defaults>
</compile_context>

<pallas_src>
import jax
import jax.numpy as jnp
from jax.experimental import pallas as pl
from jax.experimental.pallas import tpu as pltpu


def _round_up(x, m):
    return (x + m - 1) // m * m


def hybrid_embed_kernel(x_ref, w1_ref, b1_ref, w2_ref, b2_ref, o_ref):
    # x_ref : (TN, Kp)  one tile of flattened 4x4 patches (f32 or bf16)
    # w1_ref: (Kp, Fp)  backbone stem weight (flattened 4x4 conv), zero-padded
    # b1_ref: (1, Fp)   f32 bias (padded entries are exactly zero)
    # w2_ref: (Fp, Ep)  1x1 projection weight, zero-padded
    # b2_ref: (1, Ep)   f32 bias (padded entries are exactly zero)
    # o_ref : (TN, Ep)  output tile in the caller's dtype (lane-dense: Ep % 128 == 0)
    h = jnp.dot(x_ref[...], w1_ref[...], preferred_element_type=jnp.float32) + b1_ref[...]
    h = jnp.maximum(h, 0.0)                       # backbone ReLU (f32, VPU)
    h = h.astype(w2_ref.dtype)                    # bf16 for second MXU pass when enabled
    y = jnp.dot(h, w2_ref[...], preferred_element_type=jnp.float32) + b2_ref[...]
    o_ref[...] = y.astype(o_ref.dtype)


def prepare_params(w_bb, b_bb, w_proj, b_proj, *, compute_dtype=jnp.float32):
    """Flatten / transpose / zero-pad the weights ONCE (outside the per-call path).

    w_bb:   (F, C, p, p)  backbone conv weight (PyTorch OIHW layout)
    b_bb:   (F,)
    w_proj: (E, F)        1x1 projection conv weight ([E, F, 1, 1] squeezed)
    b_proj: (E,)
    """
    F_dim, C, p, _ = w_bb.shape
    E = w_proj.shape[0]
    K = C * p * p
    Kp, Fp, Ep = _round_up(K, 128), _round_up(F_dim, 128), _round_up(E, 128)

    w1 = jnp.zeros((Kp, Fp), compute_dtype)
    w1 = w1.at[:K, :F_dim].set(w_bb.reshape(F_dim, K).T.astype(compute_dtype))
    b1 = jnp.zeros((1, Fp), jnp.float32).at[0, :F_dim].set(b_bb.astype(jnp.float32))
    w2 = jnp.zeros((Fp, Ep), compute_dtype)
    w2 = w2.at[:F_dim, :E].set(w_proj.T.astype(compute_dtype))
    b2 = jnp.zeros((1, Ep), jnp.float32).at[0, :E].set(b_proj.astype(jnp.float32))

    meta = dict(K=K, F=F_dim, E=E, Kp=Kp, Fp=Fp, Ep=Ep, patch=p, in_chans=C)
    return (w1, b1, w2, b2), meta


def hybrid_embed(x_nchw, params, meta, *, tile_n=256, compute_dtype=jnp.float32):
    """x_nchw: (B, C, H, W). Returns (B, num_patches, embed_dim) in x's dtype."""
    w1, b1, w2, b2 = params
    K, E = meta["K"], meta["E"]
    Kp, Fp, Ep = meta["Kp"], meta["Fp"], meta["Ep"]
    p = meta["patch"]

    B, C, H, W = x_nchw.shape
    Hf, Wf = H // p, W // p
    N = Hf * Wf
    M = B * N                       # batch and patch dims fused: rows are independent

    # Row tile: multiple of 8 (sublane), modest so double-buffered tiles + the (TN, Fp)
    # f32 intermediate fit comfortably in VMEM on all generations (incl. 64 MiB v7x).
    TN = min(tile_n, _round_up(M, 8))
    Mp = _round_up(M, TN)

    # space-to-depth: (B,C,Hf,p,Wf,p) -> (B,Hf,Wf,C,p,p) -> (M, K); h-then-w patch order
    # matches flatten(2) of the conv output.  Layout plumbing only -> stays in XLA.
    patches = (
        x_nchw.reshape(B, C, Hf, p, Wf, p)
        .transpose(0, 2, 4, 1, 3, 5)
        .reshape(M, K)
        .astype(compute_dtype)
    )
    # zero-pad rows to a multiple of TN and K up to Kp (lane-dense, full MXU contraction)
    patches = jnp.pad(patches, ((0, Mp - M), (0, Kp - K)))

    grid = (Mp // TN,)
    in_itemsize = jnp.dtype(compute_dtype).itemsize
    out_itemsize = jnp.dtype(x_nchw.dtype).itemsize
    flops = 2 * Mp * (Kp * Fp + Fp * Ep)
    bytes_accessed = (
        Mp * Kp * in_itemsize                # patches
        + (Kp * Fp + Fp * Ep) * in_itemsize  # weights
        + (Fp + Ep) * 4                      # biases
        + Mp * Ep * out_itemsize             # output
    )

    out = pl.pallas_call(
        hybrid_embed_kernel,
        out_shape=jax.ShapeDtypeStruct((Mp, Ep), x_nchw.dtype),
        grid_spec=pltpu.PrefetchScalarGridSpec(
            num_scalar_prefetch=0,
            grid=grid,
            in_specs=[
                pl.BlockSpec((TN, Kp), lambda n: (n, 0)),
                pl.BlockSpec((Kp, Fp), lambda n: (0, 0)),
                pl.BlockSpec((1, Fp), lambda n: (0, 0)),
                pl.BlockSpec((Fp, Ep), lambda n: (0, 0)),
                pl.BlockSpec((1, Ep), lambda n: (0, 0)),
            ],
            out_specs=pl.BlockSpec((TN, Ep), lambda n: (n, 0)),
        ),
        compiler_params=pltpu.CompilerParams(
            # independent row tiles -> v7x can shard across its 2 TensorCores;
            # harmless no-op on v5e/v6e (single TC).
            dimension_semantics=("parallel",),
            vmem_limit_bytes=32 * 1024 * 1024,
        ),
        cost_estimate=pl.CostEstimate(
            flops=flops, transcendentals=0, bytes_accessed=bytes_accessed
        ),
    )(patches, w1, b1, w2, b2)

    # strip row- and E-padding, restore (B, N, E)
    return out[:M, :E].reshape(B, N, E)


def reference(x_nchw, w_bb, b_bb, w_proj, b_proj, *, patch=4):
    """Pure-JAX reference mirroring the PyTorch forward (conv backbone + 1x1 proj)."""
    feat = jax.lax.conv_general_dilated(
        x_nchw, w_bb, window_strides=(patch, patch), padding="VALID",
        dimension_numbers=("NCHW", "OIHW", "NCHW"),
    ) + b_bb[None, :, None, None]
    feat = jnp.maximum(feat, 0.0)
    proj = jax.lax.conv_general_dilated(
        feat, w_proj[:, :, None, None], window_strides=(1, 1), padding="VALID",
        dimension_numbers=("NCHW", "OIHW", "NCHW"),
    ) + b_proj[None, :, None, None]
    B, E, Hf, Wf = proj.shape
    return proj.reshape(B, E, Hf * Wf).transpose(0, 2, 1)   # flatten(2).transpose(1,2)


if __name__ == "__main__":
    key = jax.random.PRNGKey(0)
    k1, k2, k3, k4, k5 = jax.random.split(key, 5)

    # small shapes: B=2, in_chans=3, img=16x16, feature_dim=32, embed_dim=48, patch=4
    B, C, H, W = 2, 3, 16, 16
    FEAT, EMB, P = 32, 48, 4

    x = jax.random.normal(k1, (B, C, H, W), dtype=jnp.float32)
    w_bb = 0.1 * jax.random.normal(k2, (FEAT, C, P, P), dtype=jnp.float32)
    b_bb = 0.1 * jax.random.normal(k3, (FEAT,), dtype=jnp.float32)
    w_proj = 0.1 * jax.random.normal(k4, (EMB, FEAT), dtype=jnp.float32)
    b_proj = 0.1 * jax.random.normal(k5, (EMB,), dtype=jnp.float32)

    ref = reference(x, w_bb, b_bb, w_proj, b_proj, patch=P)

    # f32 path: exact-ish check against the conv reference
    params_f32, meta = prepare_params(w_bb, b_bb, w_proj, b_proj, compute_dtype=jnp.float32)
    out = hybrid_embed(x, params_f32, meta, compute_dtype=jnp.float32)
    out = jax.block_until_ready(out)
    assert out.shape == (B, (H // P) * (W // P), EMB), out.shape
    assert jnp.allclose(out, ref, atol=1e-4, rtol=1e-4), float(jnp.max(jnp.abs(out - ref)))

    # bf16 MXU fast path (v6e/v7x): same kernel, looser tolerance vs f32 reference
    params_bf16, meta_bf = prepare_params(w_bb, b_bb, w_proj, b_proj, compute_dtype=jnp.bfloat16)
    out_bf = hybrid_embed(x, params_bf16, meta_bf, compute_dtype=jnp.bfloat16)
    out_bf = jax.block_until_ready(out_bf)
    assert out_bf.shape == (B, (H // P) * (W // P), EMB), out_bf.shape
    assert jnp.allclose(out_bf, ref, atol=3e-2, rtol=3e-2), float(jnp.max(jnp.abs(out_bf - ref)))

    print("KERNEL_OK")
</pallas_src>

<mosaic_0001>
module attributes {stable_mosaic.version = 11 : i64} {
  func.func @hybrid_embed_kernel(%arg0: i32, %arg1: memref<32x128xf32, #tpu.memory_space<vmem>>, %arg2: memref<128x128xf32, #tpu.memory_space<vmem>>, %arg3: memref<1x128xf32, #tpu.memory_space<vmem>>, %arg4: memref<128x128xf32, #tpu.memory_space<vmem>>, %arg5: memref<1x128xf32, #tpu.memory_space<vmem>>, %arg6: memref<32x128xf32, #tpu.memory_space<vmem>>) attributes {dimension_semantics = [#tpu.dimension_semantics<parallel>], iteration_bounds = array<i64: 1>, scalar_prefetch = 0 : i64, scratch_operands = 0 : i64, tpu.core_type = #tpu.core_type<tc>, window_params = [{transform_indices = @transform_0, window_bounds = array<i64: 32, 128>}, {pipeline_mode = #tpu.pipeline_mode<synchronous>, transform_indices = @transform_1, window_bounds = array<i64: 128, 128>}, {pipeline_mode = #tpu.pipeline_mode<synchronous>, transform_indices = @transform_2, window_bounds = array<i64: 1, 128>}, {pipeline_mode = #tpu.pipeline_mode<synchronous>, transform_indices = @transform_3, window_bounds = array<i64: 128, 128>}, {pipeline_mode = #tpu.pipeline_mode<synchronous>, transform_indices = @transform_4, window_bounds = array<i64: 1, 128>}, {transform_indices = @transform_5, window_bounds = array<i64: 32, 128>}]} {
    %c0 = arith.constant 0 : index
    %c0_0 = arith.constant 0 : index
    %0 = vector.load %arg1[%c0, %c0_0] : memref<32x128xf32, #tpu.memory_space<vmem>>, vector<32x128xf32>
    %c0_1 = arith.constant 0 : index
    %c0_2 = arith.constant 0 : index
    %1 = vector.load %arg2[%c0_1, %c0_2] : memref<128x128xf32, #tpu.memory_space<vmem>>, vector<128x128xf32>
    %cst = arith.constant dense<0.000000e+00> : vector<32x128xf32>
    %2 = tpu.matmul %0, %1, %cst {dimension_numbers = #tpu.dot_dimension_numbers<[1], [0], [0], [1], [0, 0, 1, 1], [], []>} : vector<32x128xf32>, vector<128x128xf32>, vector<32x128xf32> -> vector<32x128xf32>
    %c0_3 = arith.constant 0 : index
    %c0_4 = arith.constant 0 : index
    %3 = vector.load %arg3[%c0_3, %c0_4] : memref<1x128xf32, #tpu.memory_space<vmem>>, vector<1x128xf32>
    %4 = vector.broadcast %3 : vector<1x128xf32> to vector<32x128xf32>
    %5 = arith.addf %2, %4 : vector<32x128xf32>
    %cst_5 = arith.constant 0.000000e+00 : f32
    %6 = vector.broadcast %cst_5 : f32 to vector<32x128xf32>
    %7 = arith.maximumf %5, %6 : vector<32x128xf32>
    %c0_6 = arith.constant 0 : index
    %c0_7 = arith.constant 0 : index
    %8 = vector.load %arg4[%c0_6, %c0_7] : memref<128x128xf32, #tpu.memory_space<vmem>>, vector<128x128xf32>
    %cst_8 = arith.constant dense<0.000000e+00> : vector<32x128xf32>
    %9 = tpu.matmul %7, %8, %cst_8 {dimension_numbers = #tpu.dot_dimension_numbers<[1], [0], [0], [1], [0, 0, 1, 1], [], []>} : vector<32x128xf32>, vector<128x128xf32>, vector<32x128xf32> -> vector<32x128xf32>
    %c0_9 = arith.constant 0 : index
    %c0_10 = arith.constant 0 : index
    %10 = vector.load %arg5[%c0_9, %c0_10] : memref<1x128xf32, #tpu.memory_space<vmem>>, vector<1x128xf32>
    %11 = vector.broadcast %10 : vector<1x128xf32> to vector<32x128xf32>
    %12 = arith.addf %9, %11 : vector<32x128xf32>
    %c0_11 = arith.constant 0 : index
    %c0_12 = arith.constant 0 : index
    %13 = vector.load %arg6[%c0_11, %c0_12] : memref<32x128xf32, #tpu.memory_space<vmem>>, vector<32x128xf32>
    tpu.vector_store %arg6[%c0_11, %c0_12], %12 {strides = array<i32>} : memref<32x128xf32, #tpu.memory_space<vmem>>, vector<32x128xf32>,
    return
  }
  func.func @transform_0(%arg0: i32) -> (i32, i32) {
    %c0_i32 = arith.constant 0 : i32
    %c0_i32_0 = arith.constant 0 : i32
    return %arg0, %c0_i32 : i32, i32
  }
  func.func @transform_1(%arg0: i32) -> (i32, i32) {
    %c0_i32 = arith.constant 0 : i32
    %c0_i32_0 = arith.constant 0 : i32
    %c0_i32_1 = arith.constant 0 : i32
    return %c0_i32, %c0_i32_0 : i32, i32
  }
  func.func @transform_2(%arg0: i32) -> (i32, i32) {
    %c0_i32 = arith.constant 0 : i32
    %c0_i32_0 = arith.constant 0 : i32
    %c0_i32_1 = arith.constant 0 : i32
    return %c0_i32, %c0_i32_0 : i32, i32
  }
  func.func @transform_3(%arg0: i32) -> (i32, i32) {
    %c0_i32 = arith.constant 0 : i32
    %c0_i32_0 = arith.constant 0 : i32
    %c0_i32_1 = arith.constant 0 : i32
    return %c0_i32, %c0_i32_0 : i32, i32
  }
  func.func @transform_4(%arg0: i32) -> (i32, i32) {
    %c0_i32 = arith.constant 0 : i32
    %c0_i32_0 = arith.constant 0 : i32
    %c0_i32_1 = arith.constant 0 : i32
    return %c0_i32, %c0_i32_0 : i32, i32
  }
  func.func @transform_5(%arg0: i32) -> (i32, i32) {
    %c0_i32 = arith.constant 0 : i32
    %c0_i32_0 = arith.constant 0 : i32
    return %arg0, %c0_i32 : i32, i32
  }
}

</mosaic_0001>

<bundles_post_ra>
// kernel: tpu_custom_call.1
= control target key start
LH: loop header
LB: loop body
LE: loop exit
PB: predicated region body
PF: predicated region fallthrough
CT: control target
= control target key end

     0   :  { %10 = vsyncpa [#allocation3], 0  ;;  %s406_s0 = inlined_call_operand.hbm [shape: f32[32,128], index: 0, kind: input, shape index: {}]   ;;  %s407_s1 = inlined_call_operand.hbm [shape: f32[128,128], index: 1, kind: input, shape index: {}]   ;;  %s408_s2 = inlined_call_operand.vmem [shape: f32[1,128], index: 2, kind: input, shape index: {}]   ;;  %s409_s3 = inlined_call_operand.hbm [shape: f32[128,128], index: 3, kind: input, shape index: {}]   ;;  %s410_s4 = inlined_call_operand.vmem [shape: f32[1,128], index: 4, kind: input, shape index: {}]   ;;  %s411_s5 = inlined_call_operand.hbm [shape: f32[32,128], index: 5, kind: output, shape index: {}]  }
   0x1   :  { %11 = vsyncpa [#allocation6], 0 }
   0x2   :  { %12 = vsyncpa [#allocation4], 0  ;;  %s30_s20 = sshll.u32 %s407_s1, 4  ;;  %s340_s21 = smov [#allocation5]   ;;  %s31_s20 = int_to_ptr.hbm [resolvable:$true] %s30_s20 }
   0x3   :  { %s32_s22 = sshll.u32 %s340_s21, 4  ;;  %s17_s25 = sshll.u32 %s406_s0, 4  ;;  %s33_s22 = int_to_ptr.vmem [resolvable:$true] %s32_s22  ;;  %s18_s25 = int_to_ptr.hbm [resolvable:$true] %s17_s25 }
   0x4   :  { %s341_s26 = smov 128   ;;  %s342_s27 = smov 8  }
   0x5   :  { %38 = dma.hbm_to_vmem [thread:$0]  %s31_s20, 2048, %s33_s22, [#allocation6], %s341_s26, %s341_s26, %s342_s27  }
   0x6   :  { %s343_s28 = smov [#allocation2]   ;;  %s45_s1 = sshll.u32 %s409_s3, 4  ;;  %s46_s1 = int_to_ptr.hbm [resolvable:$true] %s45_s1 }
   0x7   :  { %s19_s29 = sshll.u32 %s343_s28, 4  ;;  %s344_s0 = smov [#allocation7]   ;;  %s20_s29 = int_to_ptr.vmem [resolvable:$true] %s19_s29 }
   0x8   :  { %25 = dma.hbm_to_vmem [thread:$0]  %s18_s25, 512, %s20_s29, [#allocation3], %s341_s26, %s341_s26, %s342_s27  }
   0x9   :  { %s47_s7 = sshll.u32 %s344_s0, 4  ;;  %s48_s7 = int_to_ptr.vmem [resolvable:$true] %s47_s7 }
   0xa   :  { %53 = dma.hbm_to_vmem [thread:$0]  %s46_s1, 2048, %s48_s7, [#allocation6], %s341_s26, %s341_s26, %s342_s27  }
   0xb   :  { %334 = dma.done.wait [#allocation3], 512  }
   0xc   :  { %335 = vsyncadd [#allocation3], 4294966784 }
   0xd   :  { %336 = dma.done.wait [#allocation6], 4096  }
   0xe   :  { %337 = vsyncadd [#allocation6], 4294963200  ;;  %v87_v0 = vld [vmem:[#allocation5 + $0x78] sm:$0xff]  ;;  %v86_v1 = vld [vmem:[#allocation5 + $0x70] sm:$0xff]  ;;  %s184_s14 = sshll.u32 %s411_s5, 4  ;;  %s185_s14 = int_to_ptr.hbm [resolvable:$true] %s184_s14 }
   0xf   :  { %198 = vmatpush.msra.mxu2 %v87_v0  ;;  %92 = vmatpush.msra.mxu0 %v87_v0  ;;  %v85_v2 = vld [vmem:[#allocation5 + $0x68] sm:$0xff]  ;;  %v84_v3 = vld [vmem:[#allocation5 + $0x60] sm:$0xff]  ;;  %v83_v4 = vld [vmem:[#allocation5 + $0x58] sm:$0xff] }
  0x10   :  { %v82_v5 = vld [vmem:[#allocation5 + $0x50] sm:$0xff]  ;;  %v140_v6 = vld [vmem:[#allocation7 + $0x78] sm:$0xff]  ;;  %v81_v8 = vld [vmem:[#allocation5 + $0x48] sm:$0xff] }
  0x11   :  { %199 = vmatpush.msra.mxu2 %v86_v1  ;;  %93 = vmatpush.msra.mxu0 %v86_v1  ;;  %v139_v7 = vld [vmem:[#allocation7 + $0x70] sm:$0xff]  ;;  %v138_v9 = vld [vmem:[#allocation7 + $0x68] sm:$0xff]  ;;  %v80_v10 = vld [vmem:[#allocation5 + $0x40] sm:$0xff] }
  0x12   :  { %214 = vmatpush.msra.mxu3 %v140_v6  ;;  %145 = vmatpush.msra.mxu1 %v140_v6  ;;  %v137_v11 = vld [vmem:[#allocation7 + $0x60] sm:$0xff]  ;;  %v79_v12 = vld [vmem:[#allocation5 + $0x38] sm:$0xff]  ;;  %v78_v14 = vld [vmem:[#allocation5 + $0x30] sm:$0xff] }
  0x13   :  { %200 = vmatpush.msra.mxu2 %v85_v2  ;;  %94 = vmatpush.msra.mxu0 %v85_v2  ;;  %v136_v13 = vld [vmem:[#allocation7 + $0x58] sm:$0xff]  ;;  %v135_v15 = vld [vmem:[#allocation7 + $0x50] sm:$0xff]  ;;  %v77_v16 = vld [vmem:[#allocation5 + $0x28] sm:$0xff] }
  0x14   :  { %215 = vmatpush.msra.mxu3 %v139_v7  ;;  %146 = vmatpush.msra.mxu1 %v139_v7  ;;  %v134_v17 = vld [vmem:[#allocation7 + $0x48] sm:$0xff]  ;;  %v76_v18 = vld [vmem:[#allocation5 + $0x20] sm:$0xff]  ;;  %v75_v20 = vld [vmem:[#allocation5 + $0x18] sm:$0xff] }
  0x15   :  { %201 = vmatpush.msra.mxu2 %v84_v3  ;;  %95 = vmatpush.msra.mxu0 %v84_v3  ;;  %v133_v19 = vld [vmem:[#allocation7 + $0x40] sm:$0xff]  ;;  %v132_v21 = vld [vmem:[#allocation7 + $0x38] sm:$0xff]  ;;  %v74_v22 = vld [vmem:[#allocation5 + $0x10] sm:$0xff] }
  0x16   :  { %216 = vmatpush.msra.mxu3 %v138_v9  ;;  %147 = vmatpush.msra.mxu1 %v138_v9  ;;  %v131_v23 = vld [vmem:[#allocation7 + $0x30] sm:$0xff]  ;;  %v73_v24 = vld [vmem:[#allocation5 + $0x8] sm:$0xff]  ;;  %v72_v26 = vld [vmem:[#allocation5] sm:$0xff] }
  0x17   :  { %202 = vmatpush.msra.mxu2 %v83_v4  ;;  %96 = vmatpush.msra.mxu0 %v83_v4  ;;  %v130_v25 = vld [vmem:[#allocation7 + $0x28] sm:$0xff]  ;;  %v70_v27 = vld [vmem:[#allocation2 + $0x10] sm:$0xff]  ;;  %v68_v28 = vld [vmem:[#allocation2] sm:$0xff] }
  0x18   :  { %217 = vmatpush.msra.mxu3 %v137_v11  ;;  %148 = vmatpush.msra.mxu1 %v137_v11  ;;  %v129_v29 = vld [vmem:[#allocation7 + $0x20] sm:$0xff]  ;;  %v128_v30 = vld [vmem:[#allocation7 + $0x18] sm:$0xff]  ;;  %v69_v32 = vld [vmem:[#allocation2 + $0x8] sm:$0xff] }
  0x19   :  { %203 = vmatpush.msra.mxu2 %v82_v5  ;;  %97 = vmatpush.msra.mxu0 %v82_v5  ;;  %v71_v31 = vld [vmem:[#allocation2 + $0x18] sm:$0xff]  ;;  %v127_v33 = vld [vmem:[#allocation7 + $0x10] sm:$0xff]  ;;  %v126_v34 = vld [vmem:[#allocation7 + $0x8] sm:$0xff] }
  0x1a   :  { %218 = vmatpush.msra.mxu3 %v136_v13  ;;  %149 = vmatpush.msra.mxu1 %v136_v13  ;;  %v125_v35 = vld [vmem:[#allocation7] sm:$0xff] }
  0x1b   :  { %204 = vmatpush.msra.mxu2 %v81_v8  ;;  %98 = vmatpush.msra.mxu0 %v81_v8  ;;  %v236_v36 = vld [vmem:[%s408_s2] ss:$0 sm:$0xff]  ;;  %s345_s2 = smov [#allocation8]  }
  0x1c   :  { %219 = vmatpush.msra.mxu3 %v135_v15  ;;  %150 = vmatpush.msra.mxu1 %v135_v15  ;;  %v237_v49 = vld [vmem:[%s410_s4] ss:$0 sm:$0xff]  ;;  %s182_s11 = sshll.u32 %s345_s2, 4  ;;  %s183_s11 = int_to_ptr.vmem [resolvable:$true] %s182_s11 }
  0x1d   :  { %205 = vmatpush.msra.mxu2 %v80_v10  ;;  %99 = vmatpush.msra.mxu0 %v80_v10 }
  0x1e   :  { %220 = vmatpush.msra.mxu3 %v134_v17  ;;  %151 = vmatpush.msra.mxu1 %v134_v17 }
  0x1f   :  { %206 = vmatpush.msra.mxu2 %v79_v12  ;;  %100 = vmatpush.msra.mxu0 %v79_v12 }
  0x20   :  { %221 = vmatpush.msra.mxu3 %v133_v19  ;;  %152 = vmatpush.msra.mxu1 %v133_v19 }
  0x21   :  { %207 = vmatpush.msra.mxu2 %v78_v14  ;;  %101 = vmatpush.msra.mxu0 %v78_v14 }
  0x22   :  { %222 = vmatpush.msra.mxu3 %v132_v21  ;;  %153 = vmatpush.msra.mxu1 %v132_v21 }
  0x23   :  { %208 = vmatpush.msra.mxu2 %v77_v16  ;;  %102 = vmatpush.msra.mxu0 %v77_v16 }
  0x24   :  { %223 = vmatpush.msra.mxu3 %v131_v23  ;;  %154 = vmatpush.msra.mxu1 %v131_v23 }
  0x25   :  { %209 = vmatpush.msra.mxu2 %v76_v18  ;;  %103 = vmatpush.msra.mxu0 %v76_v18 }
  0x26   :  { %224 = vmatpush.msra.mxu3 %v130_v25  ;;  %155 = vmatpush.msra.mxu1 %v130_v25 }
  0x27   :  { %210 = vmatpush.msra.mxu2 %v75_v20  ;;  %104 = vmatpush.msra.mxu0 %v75_v20 }
  0x28   :  { %225 = vmatpush.msra.mxu3 %v129_v29  ;;  %156 = vmatpush.msra.mxu1 %v129_v29 }
  0x29   :  { %211 = vmatpush.msra.mxu2 %v74_v22  ;;  %105 = vmatpush.msra.mxu0 %v74_v22 }
  0x2a   :  { %226 = vmatpush.msra.mxu3 %v128_v30  ;;  %157 = vmatpush.msra.mxu1 %v128_v30 }
  0x2b   :  { %212 = vmatpush.msra.mxu2 %v73_v24  ;;  %106 = vmatpush.msra.mxu0 %v73_v24 }
  0x2c   :  { %227 = vmatpush.msra.mxu3 %v127_v33  ;;  %158 = vmatpush.msra.mxu1 %v127_v33 }
  0x2d   :  { %213 = vmatpush.msra.mxu2 %v72_v26  ;;  %107 = vmatpush.msra.mxu0 %v72_v26 }
  0x2e   :  { %114 = vmatmul.f32.vlgmr.msra.gmra.mxu2 %v70_v27  ;;  %108 = vmatmul.f32.vlgmr.msra.gmra.mxu0 %v68_v28 }
  0x2f   :  { %228 = vmatpush.msra.mxu3 %v126_v34  ;;  %159 = vmatpush.msra.mxu1 %v126_v34 }
  0x31   :  { %229 = vmatpush.msra.mxu3 %v125_v35  ;;  %160 = vmatpush.msra.mxu1 %v125_v35 }
  0x36   :  { %117 = vmatmul.f32.gmra.mxu2 %v71_v31  ;;  %111 = vmatmul.f32.gmra.mxu0 %v69_v32 }
  0xab   :  { %v109_v37 = vpop.f32.mrf.mxu0 }
  0xac   :  { %v110_v38 = vadd.f32 %v236_v36, %v109_v37 }
  0xae   :  { %v121_v39 = vmax.f32 %v110_v38, 0.0 }
  0xb0   :  { %161 = vmatmul.f32.vlgmr.msra.gmra.mxu1 %v121_v39 }
  0xb1   :  { %v115_v40 = vpop.f32.mrf.mxu2 }
  0xb2   :  { %v116_v41 = vadd.f32 %v236_v36, %v115_v40 }
  0xb3   :  { %v112_v42 = vpop.f32.mrf.mxu0 }
  0xb4   :  { %v123_v43 = vmax.f32 %v116_v41, 0.0  ;;  %v113_v44 = vadd.f32 %v236_v36, %v112_v42 }
  0xb6   :  { %167 = vmatmul.f32.vlgmr.msra.gmra.mxu3 %v123_v43  ;;  %v122_v45 = vmax.f32 %v113_v44, 0.0 }
  0xb8   :  { %164 = vmatmul.f32.gmra.mxu1 %v122_v45 }
  0xb9   :  { %v118_v46 = vpop.f32.mrf.mxu2 }
  0xba   :  { %v119_v47 = vadd.f32 %v236_v36, %v118_v46 }
  0xbc   :  { %v124_v48 = vmax.f32 %v119_v47, 0.0 }
  0xbe   :  { %170 = vmatmul.f32.gmra.mxu3 %v124_v48 }
 0x12d   :  { %v162_v50 = vpop.f32.mrf.mxu1 }
 0x12e   :  { %v163_v51 = vadd.f32 %v237_v49, %v162_v50 }
 0x130   :  { %174 = vst [vmem:[#allocation8] sm:$0xff] %v163_v51 }
 0x135   :  { %v165_v52 = vpop.f32.mrf.mxu1 }
 0x136   :  { %v166_v53 = vadd.f32 %v237_v49, %v165_v52 }
 0x138   :  { %175 = vst [vmem:[#allocation8 + $0x8] sm:$0xff] %v166_v53 }
 0x139   :  { %v168_v54 = vpop.f32.mrf.mxu3 }
 0x13a   :  { %v169_v55 = vadd.f32 %v237_v49, %v168_v54 }
 0x13c   :  { %176 = vst [vmem:[#allocation8 + $0x10] sm:$0xff] %v169_v55 }
 0x141   :  { %v171_v56 = vpop.f32.mrf.mxu3 }
 0x142   :  { %v172_v57 = vadd.f32 %v237_v49, %v171_v56 }
 0x144   :  { %177 = vst [vmem:[#allocation8 + $0x18] sm:$0xff] %v172_v57 }
 0x145   :  { %190 = dma.vmem_to_hbm [thread:$0]  %s183_s11, 512, %s185_s14, [#allocation4], %s341_s26, %s341_s26, %s342_s27  }
 0x146   :  { %338 = dma.done.wait [#allocation4], 512  }
 0x147   :  { %339 = vsyncadd [#allocation4], 4294966784 }
 0x148   :  { %195 = vsyncpa [#allocation3], 1 }
 0x149   :  { %196 = vsyncpa [#allocation6], 1 }
 0x14a   :  { %197 = vsyncpa [#allocation4], 1 }

</bundles_post_ra>
